<compile_context>
chip_gen: v5e
topology: v5e:2x2
jax: 0.10.0
libtpu: 0.0.40
codegen_flags: <defaults>
</compile_context>

<pallas_src>
import jax
import jax.numpy as jnp
from jax.experimental import pallas as pl
from jax.experimental.pallas import tpu as pltpu

LN_EPS = 1e-5
BN_EPS = 1e-5


def _pick_tb(b, n, f_in, f_out, y_bytes):
    """Batch-tile size for the fused LN+Linear+stats kernel.

    Any tb is layout-legal (the block's trailing (N, f) dims are full extents), so pick
    the largest divisor of B that (a) keeps >= 2 grid steps whenever B allows it
    (input/output pipelining, and both TensorCores on megacore / v7x chips),
    (b) targets ~1024 matmul rows per step, and (c) keeps the double-buffered per-step
    footprint well inside the smallest scoped-VMEM default (v5e: 16 MiB)."""
    target_rows = 1024
    budget = 12 * 1024 * 1024
    best = 1
    for d in range(1, b + 1):
        if b % d:
            continue
        if b >= 2 and b // d < 2:
            continue                      # keep >= 2 grid steps when possible
        rows = d * n
        if rows > max(target_rows, n):
            continue
        step_bytes = 2 * rows * (f_in * 4 + f_out * y_bytes + 2 * 4)  # x + y + stats, 2-buffered
        if step_bytes > budget:
            continue
        best = d
    return best


def _vmem_limit(tb, n, f_in, f_out, y_bytes):
    """Explicit scoped-VMEM limit from the per-step footprint (+ weights, + headroom)."""
    step = 2 * tb * n * (f_in * 4 + f_out * y_bytes + 2 * 4)          # double-buffered blocks
    weights = 2 * (f_in * f_out * 4 + n * (f_out + 1) * 4)            # w_t, bias_nf, ln_w
    return int(min(64 * 1024 * 1024, max(16 * 1024 * 1024, 2 * (step + weights))))


def _ln_linear_stats_kernel(x_ref, lnw_ref, bias_ref, w_ref, y_ref, stats_ref):
    """Per batch-tile: LayerNorm over the node axis -> Linear -> partial BN statistics.

    x_ref    : (TB, N, F_in)   input block
    lnw_ref  : (N, 1)          LayerNorm weight (per node)
    bias_ref : (N, F_out)      folded bias = ln_b[n] * colsum(W) + fc_b
    w_ref    : (F_in, F_out)   fc weight, transposed
    y_ref    : (TB, N, F_out)  pre-BN activations (stored in y_ref.dtype, e.g. bf16)
    stats_ref: (TB, N, 2)      per-(batch, node) [sum(y), sum(y*y)] partial BN stats (f32)
    """
    x = x_ref[...].astype(jnp.float32)                        # (TB, N, F_in)
    # "Space LayerNorm": normalize over the node axis, per (batch, feature) column.
    mean = jnp.mean(x, axis=1, keepdims=True)
    centered = x - mean
    var = jnp.mean(centered * centered, axis=1, keepdims=True)
    xn = centered * jax.lax.rsqrt(var + LN_EPS)                # (TB, N, F_in)

    tb, n, f_in = x_ref.shape
    f_out = y_ref.shape[-1]
    # One MXU matmul per tile; leading-dim collapse/split reshapes are free.
    y = jnp.dot(xn.reshape(tb * n, f_in), w_ref[...],
                preferred_element_type=jnp.float32)            # (TB*N, F_out)
    y = y.reshape(tb, n, f_out)
    # Folded affine: (xn*a + b) @ W + c == a * (xn @ W) + (b * colsum(W) + c)
    y = y * lnw_ref[...] + bias_ref[...]

    y_ref[...] = y.astype(y_ref.dtype)
    # Partial BatchNorm statistics, accumulated in f32 (before any bf16 downcast).
    stats_ref[:, :, 0:1] = jnp.sum(y, axis=2, keepdims=True)
    stats_ref[:, :, 1:2] = jnp.sum(y * y, axis=2, keepdims=True)


def sln_lr_forward(history_data, long_history_data, future_data, params,
                   prediction_seq_len, output_dim, y_dtype=jnp.bfloat16):
    # history_data / future_data are unused by the PyTorch forward (signature parity).
    del history_data, future_data
    B, L, N, C = long_history_data.shape
    f_in = L * C
    f_out = prediction_seq_len * output_dim

    # Glue: [B, L, N, C] -> [B, N, L*C].
    # TODO(synk): this rearrangement could be folded into the kernel as an in-VMEM relayout
    # (XLU slot is idle here), but the C-minor strided DMA needs measuring first; kept as an
    # XLA transpose for now.
    x = jnp.transpose(long_history_data, (0, 2, 1, 3)).reshape(B, N, f_in)

    y_bytes = jnp.dtype(y_dtype).itemsize
    tb = _pick_tb(B, N, f_in, f_out, y_bytes)
    num_tiles = B // tb

    # ---- Parameter prep (weight-sized ops only; no batch-sized tiling). ----------------
    w_t = params["fc_weight"].T.astype(jnp.float32)                  # (f_in, f_out)
    ln_w = params["ln_weight"].astype(jnp.float32).reshape(N, 1)     # (N, 1)
    bias_nf = (params["ln_bias"].astype(jnp.float32)[:, None]
               * jnp.sum(w_t, axis=0)[None, :]
               + params["fc_bias"].astype(jnp.float32)[None, :])     # (N, f_out)

    # ---- Fused LayerNorm-over-nodes + Linear + partial BN stats (single Pallas pass). --
    # NOTE: f_out < 128 leaves the y store lane-sparse (masked vst); a lane-dense repack
    # was considered but rejected here because the natural (B, N, f_out) layout feeds the
    # fused XLA BN/transpose consumer directly.  Revisit if production f_out >= 128.
    y, stats = pl.pallas_call(
        _ln_linear_stats_kernel,
        out_shape=(
            jax.ShapeDtypeStruct((B, N, f_out), y_dtype),
            jax.ShapeDtypeStruct((B, N, 2), jnp.float32),
        ),
        grid_spec=pltpu.PrefetchScalarGridSpec(
            num_scalar_prefetch=0,
            grid=(num_tiles,),
            in_specs=[
                pl.BlockSpec((tb, N, f_in), lambda i: (i, 0, 0)),
                pl.BlockSpec((N, 1), lambda i: (0, 0)),
                pl.BlockSpec((N, f_out), lambda i: (0, 0)),
                pl.BlockSpec((f_in, f_out), lambda i: (0, 0)),
            ],
            out_specs=[
                pl.BlockSpec((tb, N, f_out), lambda i: (i, 0, 0)),
                pl.BlockSpec((tb, N, 2), lambda i: (i, 0, 0)),
            ],
        ),
        compiler_params=pltpu.CompilerParams(
            dimension_semantics=("parallel",),
            vmem_limit_bytes=_vmem_limit(tb, N, f_in, f_out, y_bytes),
        ),
    )(x, ln_w, bias_nf, w_t)

    # ---- Reduce partial stats to per-node fused BN scale/shift (tiny: B*N*2 floats). ---
    # TODO(synk): BatchNorm running_mean/running_var (momentum) buffer updates are stateful
    # PyTorch module state and are not emitted here.
    cnt = jnp.float32(B * f_out)
    node_sum = jnp.sum(stats[..., 0], axis=0)                        # (N,)
    node_sq = jnp.sum(stats[..., 1], axis=0)                         # (N,)
    bn_mean = node_sum / cnt
    # One-pass (E[y^2] - E[y]^2) variance in f32; clamp guards cancellation-induced
    # tiny negatives.  Switch to a shifted/Welford accumulation if |y| grows large.
    bn_var = jnp.maximum(node_sq / cnt - bn_mean * bn_mean, 0.0)
    bn_scale = params["bn_weight"].astype(jnp.float32) * jax.lax.rsqrt(bn_var + BN_EPS)
    bn_shift = params["bn_bias"].astype(jnp.float32) - bn_mean * bn_scale

    # ---- BN apply + final layout in ONE XLA-fused pass (replaces the old Kernel B). ----
    # y is read exactly once (bf16 by default) and the final output written once; no extra
    # activation-slab HBM round trip and no extra kernel launch.
    z = y.astype(jnp.float32) * bn_scale[None, :, None] + bn_shift[None, :, None]
    out = z.reshape(B, N, prediction_seq_len, output_dim)
    return jnp.transpose(out, (0, 2, 1, 3))                          # [B, P, N, O]


def _reference_forward(long_history_data, params, prediction_seq_len, output_dim):
    """Pure-JAX reference mirroring the PyTorch forward (all f32)."""
    B, L, N, C = long_history_data.shape
    x = jnp.transpose(long_history_data, (0, 2, 1, 3)).reshape(B, N, L * C)
    xt = jnp.transpose(x, (0, 2, 1))                       # [B, F, N]
    mean = xt.mean(-1, keepdims=True)
    var = ((xt - mean) ** 2).mean(-1, keepdims=True)
    xt = (xt - mean) / jnp.sqrt(var + LN_EPS) * params["ln_weight"] + params["ln_bias"]
    x = jnp.transpose(xt, (0, 2, 1))                       # [B, N, F]
    y = x @ params["fc_weight"].T + params["fc_bias"]
    mean = y.mean(axis=(0, 2), keepdims=True)
    var = ((y - mean) ** 2).mean(axis=(0, 2), keepdims=True)
    y = ((y - mean) / jnp.sqrt(var + BN_EPS)
         * params["bn_weight"][None, :, None] + params["bn_bias"][None, :, None])
    y = y.reshape(B, N, prediction_seq_len, output_dim)
    return jnp.transpose(y, (0, 2, 1, 3))


if __name__ == "__main__":
    # Small shapes consistent with the module's forward.
    B = 2
    history_seq_len = 8
    prediction_seq_len = 8
    num_nodes = 16
    input_dim = 4
    output_dim = 4
    f_in = history_seq_len * input_dim        # 32
    f_out = prediction_seq_len * output_dim   # 32

    key = jax.random.PRNGKey(0)
    keys = jax.random.split(key, 9)

    history_data = jax.random.normal(keys[0], (B, history_seq_len, num_nodes, input_dim), jnp.float32)
    long_history_data = jax.random.normal(keys[1], (B, history_seq_len, num_nodes, input_dim), jnp.float32)
    future_data = jax.random.normal(keys[2], (B, prediction_seq_len, num_nodes, output_dim), jnp.float32)

    params = {
        "ln_weight": jax.random.normal(keys[3], (num_nodes,), jnp.float32) * 0.5 + 1.0,
        "ln_bias":   jax.random.normal(keys[4], (num_nodes,), jnp.float32) * 0.1,
        "fc_weight": jax.random.normal(keys[5], (f_out, f_in), jnp.float32) / jnp.sqrt(f_in),
        "fc_bias":   jax.random.normal(keys[6], (f_out,), jnp.float32) * 0.1,
        "bn_weight": jax.random.normal(keys[7], (num_nodes,), jnp.float32) * 0.5 + 1.0,
        "bn_bias":   jax.random.normal(keys[8], (num_nodes,), jnp.float32) * 0.1,
    }

    fwd = jax.jit(sln_lr_forward, static_argnums=(4, 5, 6))
    ref = _reference_forward(long_history_data, params, prediction_seq_len, output_dim)

    # 1) f32 activation stream: validates the kernel math tightly against the reference.
    out_f32 = jax.block_until_ready(
        fwd(history_data, long_history_data, future_data, params,
            prediction_seq_len, output_dim, jnp.float32))
    assert out_f32.shape == (B, prediction_seq_len, num_nodes, output_dim), out_f32.shape
    assert jnp.allclose(out_f32, ref, atol=1e-4, rtol=1e-4), float(jnp.max(jnp.abs(out_f32 - ref)))

    # 2) Default bf16 pre-BN activation stream (halves the dominant HBM traffic).
    #    BN stats are still accumulated in f32; only the stored y is bf16, so tolerance is
    #    set for bf16 rounding of the activation stream.
    out = jax.block_until_ready(
        fwd(history_data, long_history_data, future_data, params,
            prediction_seq_len, output_dim, jnp.bfloat16))
    assert out.shape == (B, prediction_seq_len, num_nodes, output_dim), out.shape
    assert jnp.allclose(out, ref, atol=5e-2, rtol=5e-2), float(jnp.max(jnp.abs(out - ref)))

    print("KERNEL_OK")
</pallas_src>

<mosaic_0001>
module attributes {stable_mosaic.version = 11 : i64} {
  func.func @_ln_linear_stats_kernel(%arg0: i32, %arg1: memref<1x16x32xf32, #tpu.memory_space<vmem>>, %arg2: memref<16x1xf32, #tpu.memory_space<vmem>>, %arg3: memref<16x32xf32, #tpu.memory_space<vmem>>, %arg4: memref<32x32xf32, #tpu.memory_space<vmem>>, %arg5: memref<1x16x32xf32, #tpu.memory_space<vmem>>, %arg6: memref<1x16x2xf32, #tpu.memory_space<vmem>>) attributes {dimension_semantics = [#tpu.dimension_semantics<parallel>], iteration_bounds = array<i64: 2>, scalar_prefetch = 0 : i64, scratch_operands = 0 : i64, tpu.core_type = #tpu.core_type<tc>, window_params = [{transform_indices = @transform_0, window_bounds = array<i64: 1, 16, 32>}, {pipeline_mode = #tpu.pipeline_mode<synchronous>, transform_indices = @transform_1, window_bounds = array<i64: 16, 1>}, {pipeline_mode = #tpu.pipeline_mode<synchronous>, transform_indices = @transform_2, window_bounds = array<i64: 16, 32>}, {pipeline_mode = #tpu.pipeline_mode<synchronous>, transform_indices = @transform_3, window_bounds = array<i64: 32, 32>}, {transform_indices = @transform_4, window_bounds = array<i64: 1, 16, 32>}, {transform_indices = @transform_5, window_bounds = array<i64: 1, 16, 2>}]} {
    %c0 = arith.constant 0 : index
    %c0_0 = arith.constant 0 : index
    %c0_1 = arith.constant 0 : index
    %0 = vector.load %arg1[%c0, %c0_0, %c0_1] : memref<1x16x32xf32, #tpu.memory_space<vmem>>, vector<1x16x32xf32>
    %cst = arith.constant dense<0.000000e+00> : vector<1x32xf32>
    %1 = vector.multi_reduction <add>, %0, %cst [1] : vector<1x16x32xf32> to vector<1x32xf32>
    %2 = vector.shape_cast %1 : vector<1x32xf32> to vector<1x1x32xf32>
    %cst_2 = arith.constant 1.600000e+01 : f32
    %3 = vector.broadcast %cst_2 : f32 to vector<1x1x32xf32>
    %4 = arith.divf %2, %3 : vector<1x1x32xf32>
    %5 = vector.broadcast %4 : vector<1x1x32xf32> to vector<1x16x32xf32>
    %6 = arith.subf %0, %5 : vector<1x16x32xf32>
    %7 = arith.mulf %6, %6 : vector<1x16x32xf32>
    %cst_3 = arith.constant dense<0.000000e+00> : vector<1x32xf32>
    %8 = vector.multi_reduction <add>, %7, %cst_3 [1] : vector<1x16x32xf32> to vector<1x32xf32>
    %9 = vector.shape_cast %8 : vector<1x32xf32> to vector<1x1x32xf32>
    %cst_4 = arith.constant 1.600000e+01 : f32
    %10 = vector.broadcast %cst_4 : f32 to vector<1x1x32xf32>
    %11 = arith.divf %9, %10 : vector<1x1x32xf32>
    %cst_5 = arith.constant 9.99999974E-6 : f32
    %12 = vector.broadcast %cst_5 : f32 to vector<1x1x32xf32>
    %13 = arith.addf %11, %12 : vector<1x1x32xf32>
    %14 = math.rsqrt %13 : vector<1x1x32xf32>
    %15 = vector.broadcast %14 : vector<1x1x32xf32> to vector<1x16x32xf32>
    %16 = arith.mulf %6, %15 : vector<1x16x32xf32>
    %17 = vector.shape_cast %16 : vector<1x16x32xf32> to vector<16x32xf32>
    %c0_6 = arith.constant 0 : index
    %c0_7 = arith.constant 0 : index
    %18 = vector.load %arg4[%c0_6, %c0_7] : memref<32x32xf32, #tpu.memory_space<vmem>>, vector<32x32xf32>
    %cst_8 = arith.constant dense<0.000000e+00> : vector<16x32xf32>
    %19 = tpu.matmul %17, %18, %cst_8 {dimension_numbers = #tpu.dot_dimension_numbers<[1], [0], [0], [1], [0, 0, 1, 1], [], []>} : vector<16x32xf32>, vector<32x32xf32>, vector<16x32xf32> -> vector<16x32xf32>
    %20 = vector.shape_cast %19 : vector<16x32xf32> to vector<1x16x32xf32>
    %c0_9 = arith.constant 0 : index
    %c0_10 = arith.constant 0 : index
    %21 = vector.load %arg2[%c0_9, %c0_10] : memref<16x1xf32, #tpu.memory_space<vmem>>, vector<16x1xf32>
    %22 = vector.shape_cast %21 : vector<16x1xf32> to vector<1x16x1xf32>
    %23 = vector.broadcast %22 : vector<1x16x1xf32> to vector<1x16x32xf32>
    %24 = arith.mulf %20, %23 : vector<1x16x32xf32>
    %c0_11 = arith.constant 0 : index
    %c0_12 = arith.constant 0 : index
    %25 = vector.load %arg3[%c0_11, %c0_12] : memref<16x32xf32, #tpu.memory_space<vmem>>, vector<16x32xf32>
    %26 = vector.shape_cast %25 : vector<16x32xf32> to vector<1x16x32xf32>
    %27 = arith.addf %24, %26 : vector<1x16x32xf32>
    %c0_13 = arith.constant 0 : index
    %c0_14 = arith.constant 0 : index
    %c0_15 = arith.constant 0 : index
    %28 = vector.load %arg5[%c0_13, %c0_14, %c0_15] : memref<1x16x32xf32, #tpu.memory_space<vmem>>, vector<1x16x32xf32>
    tpu.vector_store %arg5[%c0_13, %c0_14, %c0_15], %27 {strides = array<i32>} : memref<1x16x32xf32, #tpu.memory_space<vmem>>, vector<1x16x32xf32>,
    %cst_16 = arith.constant dense<0.000000e+00> : vector<1x16xf32>
    %29 = vector.multi_reduction <add>, %27, %cst_16 [2] : vector<1x16x32xf32> to vector<1x16xf32>
    %30 = vector.shape_cast %29 : vector<1x16xf32> to vector<1x16x1xf32>
    %c0_17 = arith.constant 0 : index
    %c0_18 = arith.constant 0 : index
    %c0_19 = arith.constant 0 : index
    %31 = vector.load %arg6[%c0_17, %c0_18, %c0_19] : memref<1x16x2xf32, #tpu.memory_space<vmem>>, vector<1x16x1xf32>
    tpu.vector_store %arg6[%c0_17, %c0_18, %c0_19], %30 {strides = array<i32>} : memref<1x16x2xf32, #tpu.memory_space<vmem>>, vector<1x16x1xf32>,
    %32 = arith.mulf %27, %27 : vector<1x16x32xf32>
    %cst_20 = arith.constant dense<0.000000e+00> : vector<1x16xf32>
    %33 = vector.multi_reduction <add>, %32, %cst_20 [2] : vector<1x16x32xf32> to vector<1x16xf32>
    %34 = vector.shape_cast %33 : vector<1x16xf32> to vector<1x16x1xf32>
    %c0_21 = arith.constant 0 : index
    %c0_22 = arith.constant 0 : index
    %c1 = arith.constant 1 : index
    %35 = vector.load %arg6[%c0_21, %c0_22, %c1] : memref<1x16x2xf32, #tpu.memory_space<vmem>>, vector<1x16x1xf32>
    tpu.vector_store %arg6[%c0_21, %c0_22, %c1], %34 {strides = array<i32>} : memref<1x16x2xf32, #tpu.memory_space<vmem>>, vector<1x16x1xf32>,
    return
  }
  func.func @transform_0(%arg0: i32) -> (i32, i32, i32) {
    %c0_i32 = arith.constant 0 : i32
    %c0_i32_0 = arith.constant 0 : i32
    %c0_i32_1 = arith.constant 0 : i32
    return %arg0, %c0_i32, %c0_i32_0 : i32, i32, i32
  }
  func.func @transform_1(%arg0: i32) -> (i32, i32) {
    %c0_i32 = arith.constant 0 : i32
    %c0_i32_0 = arith.constant 0 : i32
    %c0_i32_1 = arith.constant 0 : i32
    return %c0_i32, %c0_i32_0 : i32, i32
  }
  func.func @transform_2(%arg0: i32) -> (i32, i32) {
    %c0_i32 = arith.constant 0 : i32
    %c0_i32_0 = arith.constant 0 : i32
    %c0_i32_1 = arith.constant 0 : i32
    return %c0_i32, %c0_i32_0 : i32, i32
  }
  func.func @transform_3(%arg0: i32) -> (i32, i32) {
    %c0_i32 = arith.constant 0 : i32
    %c0_i32_0 = arith.constant 0 : i32
    %c0_i32_1 = arith.constant 0 : i32
    return %c0_i32, %c0_i32_0 : i32, i32
  }
  func.func @transform_4(%arg0: i32) -> (i32, i32, i32) {
    %c0_i32 = arith.constant 0 : i32
    %c0_i32_0 = arith.constant 0 : i32
    %c0_i32_1 = arith.constant 0 : i32
    return %arg0, %c0_i32, %c0_i32_0 : i32, i32, i32
  }
  func.func @transform_5(%arg0: i32) -> (i32, i32, i32) {
    %c0_i32 = arith.constant 0 : i32
    %c0_i32_0 = arith.constant 0 : i32
    %c0_i32_1 = arith.constant 0 : i32
    return %arg0, %c0_i32, %c0_i32_0 : i32, i32, i32
  }
}

</mosaic_0001>

<bundles_post_ra>
// kernel: sln_lr_forward.1
= control target key start
LH: loop header
LB: loop body
LE: loop exit
PB: predicated region body
PF: predicated region fallthrough
CT: control target
= control target key end

     0   :  { %s523_s18 = smov 0   ;;  %s584_s0 = inlined_call_operand.vmem [shape: f32[2,16,32], index: 0, kind: input, shape index: {}]   ;;  %s585_s1 = inlined_call_operand.vmem [shape: f32[16,1], index: 1, kind: input, shape index: {}]   ;;  %s586_s2 = inlined_call_operand.vmem [shape: f32[16,32], index: 2, kind: input, shape index: {}]   ;;  %s587_s3 = inlined_call_operand.vmem [shape: f32[32,32], index: 3, kind: input, shape index: {}]   ;;  %s588_s4 = inlined_call_operand.vmem [shape: f32[2,16,32], index: 4, kind: output, shape index: {0}]   ;;  %s589_s5 = inlined_call_operand.vmem [shape: f32[2,16,2], index: 5, kind: output, shape index: {1}]  }
   0x1 LB: > { %s446_s19 = sadd.s32 4294967295, %s489_s18   ;;  %p450_p0 = scmp.ge.s32.totalorder %s489_s18, 1  ;;  %s489_s18 = sphi %s523_s18, %s16_s18  }
   0x2   : > { %p190_p1 = scmp.lt.s32.totalorder %s489_s18, 3 }
   0x4   : > { %p191_p2 = pnand %p450_p0, %p190_p1 }
   0x5   : > { %p223_p3 = scmp.lt.s32.totalorder (!%p191_p2), %s446_s19, 1 }
   0x6   : > { %194 = sbr.rel (%p191_p2) target bundleno = 333 (0x14d), region = 36 }
   0xb   : > { %v288_v0 = vld [vmem:[%s587_s3 + $0x18] sm:$0xff]  ;;  %v287_v1 = vld [vmem:[%s587_s3 + $0x10] sm:$0xff]  ;;  %v491_v2 = vmov 16.0   ;;  %v286_v3 = vld [vmem:[%s587_s3 + $0x8] sm:$0xff]  ;;  %s591_s19 = smov (!%p223_p3, %s446_s19), 1  ;;  %vm240_vm0 = vcmask 261120  }
   0xc   : > { %307 = vmatpush.msra.mxu0 %v288_v0  ;;  %464 = vmatpush.msra.mxu1 %v288_v0  ;;  %479 = vrcp.f32 %v491_v2  ;;  %v285_v4 = vld [vmem:[%s587_s3] sm:$0xff]  ;;  %s543_s28 = sshll.u32 %s591_s19, 4  ;;  %v492_v34 = vmov 0   ;;  %v319_v38 = vld [vmem:[%s585_s1 + $0x8] sm:$0xff]  ;;  %vm344_vm5 = vcmask 7168   ;;  %vm355_vm6 = vcmask 15368  }
   0xd   : > { %s227_s6 = scalar_lea.vmem %s584_s0, %s543_s28  ;;  %v318_v33 = vld [vmem:[%s585_s1] sm:$0xff]  ;;  %478 = vset.pattern.permute.xlu0 %v492_v34  ;;  %v333_v55 = vld [vmem:[%s586_s2 + $0x8] sm:$0xff]  ;;  %s232_s17 = scalar_lea.vmem %s588_s4, %s543_s28 }
   0xe   : > { %308 = vmatpush.msra.mxu0 %v287_v1  ;;  %465 = vmatpush.msra.mxu1 %v287_v1  ;;  %v238_v5 = vld [vmem:[%s227_s6] sm:$0xff]  ;;  %v239_v6 = vld [vmem:[%s227_s6 + $0x8] sm:$0xff]  ;;  %s237_s21 = scalar_lea.vmem %s589_s5, %s543_s28 }
   0xf   : > { %v241_v8 = vsel %vm240_vm0, %v238_v5, 0.0  ;;  %v242_v9 = vsel %vm240_vm0, %v239_v6, 0.0  ;;  %322 = vperm.xlu0 %478, %v318_v33   ;;  %v332_v53 = vld [vmem:[%s586_s2] sm:$0xff] }
  0x10   : > { %309 = vmatpush.msra.mxu0 %v286_v3  ;;  %466 = vmatpush.msra.mxu1 %v286_v3  ;;  %v243_v10 = vadd.f32 %v242_v9, %v241_v8 }
  0x12   : > { %v480_v7 = vpop.eup %479  ;;  %310 = vmatpush.msra.mxu0 %v285_v4  ;;  %467 = vmatpush.msra.mxu1 %v285_v4  ;;  %v244_v12 = vrot.slane %v243_v10, 4 }
  0x13   : > { %v251_v11 = vmul.f32 16.0, %v480_v7  ;;  %vm255_vm1 = vweird.f32 %v480_v7 }
  0x14   : > { %v245_v14 = vadd.f32 %v244_v12, %v243_v10 }
  0x15   : > { %v252_v13 = vsub.f32 1.0, %v251_v11 }
  0x16   : > { %v246_v16 = vrot.slane %v245_v14, 2 }
  0x17   : > { %v253_v15 = vmul.f32 %v480_v7, %v252_v13  ;;  %327 = vperm.xlu0 %478, %v319_v38  }
  0x18   : > { %v247_v18 = vadd.f32 %v246_v16, %v245_v14 }
  0x19   : > { %v254_v17 = vadd.f32 %v480_v7, %v253_v15 }
  0x1a   : > { %v248_v19 = vrot.slane %v247_v18, 1 }
  0x1b   : > { %v256_v20 = vsel %vm255_vm1, %v480_v7, %v254_v17 }
  0x1c   : > { %v249_v21 = vadd.f32 %v248_v19, %v247_v18 }
  0x1e   : > { %v257_v22 = vmul.f32 %v256_v20, %v249_v21 }
  0x20   : > { %v258_v23 = vsub.f32 %v238_v5, %v257_v22  ;;  %v259_v24 = vsub.f32 %v239_v6, %v257_v22 }
  0x22   : > { %v260_v25 = vmul.f32 %v258_v23, %v258_v23  ;;  %v261_v26 = vmul.f32 %v259_v24, %v259_v24 }
  0x24   : > { %v262_v27 = vsel %vm240_vm0, %v260_v25, 0.0  ;;  %v263_v28 = vsel %vm240_vm0, %v261_v26, 0.0 }
  0x25   : > { %v264_v29 = vadd.f32 %v263_v28, %v262_v27 }
  0x27   : > { %v265_v30 = vrot.slane %v264_v29, 4 }
  0x29   : > { %v266_v31 = vadd.f32 %v265_v30, %v264_v29 }
  0x2b   : > { %v267_v32 = vrot.slane %v266_v31, 2 }
  0x2d   : > { %v268_v35 = vadd.f32 %v267_v32, %v266_v31 }
  0x2f   : > { %v269_v36 = vrot.slane %v268_v35, 1 }
  0x31   : > { %v270_v37 = vadd.f32 %v269_v36, %v268_v35 }
  0x33   : > { %v271_v39 = vmul.f32 %v270_v37, %v256_v20 }
  0x35   : > { %v272_v40 = vadd.f32 1e-05, %v271_v39 }
  0x37   : > { %481 = vrsqrt.f32 %v272_v40  ;;  %vm279_vm2 = vweird.f32 %v272_v40 }
  0x3d   : > { %v482_v41 = vpop.eup %481 }
  0x3e   : > { %v274_v42 = vmul.f32 %v482_v41, %v272_v40  ;;  %vm280_vm3 = vweird.f32 %v482_v41 }
  0x3f   : > { %vm281_vm4 = vmor %vm279_vm2, %vm280_vm3 }
  0x40   : > { %v275_v43 = vmul.f32 %v482_v41, %v274_v42 }
  0x42   : > { %v276_v44 = vmul.f32 0.5, %v275_v43 }
  0x44   : > { %v277_v45 = vsub.f32 1.5, %v276_v44 }
  0x46   : > { %v278_v46 = vmul.f32 %v482_v41, %v277_v45 }
  0x48   : > { %v282_v47 = vsel %vm281_vm4, %v482_v41, %v278_v46 }
  0x49   : > { %v283_v48 = vmul.f32 %v282_v47, %v258_v23  ;;  %v284_v49 = vmul.f32 %v282_v47, %v259_v24 }
  0x4b   : > { %457 = vmatmul.msk.f32.vlgmr.msra.gmra.mxu0 %vm240_vm0, %v283_v48  ;;  %458 = vmatmul.msk.f32.vlgmr.msra.gmra.mxu1 %vm240_vm0, %v284_v49 }
  0x81   : > { %v323_v50 = vpop.permute.xlu0 %322 }
  0x89   : > { %v328_v51 = vpop.permute.xlu0 %327 }
  0xc8   : > { %v312_v52 = vpop.f32.mrf.mxu0  ;;  %v315_v54 = vpop.f32.mrf.mxu1 }
  0xc9   : > { %v330_v56 = vmul.f32 %v323_v50, %v312_v52  ;;  %v331_v57 = vmul.f32 %v328_v51, %v315_v54 }
  0xcb   : > { %v334_v58 = vadd.f32 %v332_v53, %v330_v56  ;;  %v335_v59 = vadd.f32 %v333_v55, %v331_v57 }
  0xcd   : > { %336 = vst.msk [vmem:[%s232_s17] sm:$0xff] %vm240_vm0, %v334_v58  ;;  %v338_v60 = vsel %vm240_vm0, %v334_v58, 0.0  ;;  %v347_v61 = vmul.f32 %v334_v58, %v334_v58  ;;  %v348_v63 = vmul.f32 %v335_v59, %v335_v59  ;;  %v341_v0 = vsel %vm240_vm0, %v335_v59, 0.0 }
  0xce   : > { %337 = vst.msk [vmem:[%s232_s17 + $0x8] sm:$0xff] %vm240_vm0, %v335_v59  ;;  %339 = vadd.xlane.f32.xlu1 %v338_v60 }
  0xcf   : > { %v349_v62 = vsel %vm240_vm0, %v347_v61, 0.0  ;;  %v352_v1 = vsel %vm240_vm0, %v348_v63, 0.0 }
  0xd0   : > { %350 = vadd.xlane.f32.xlu2 %v349_v62 }
  0xd6   : > { %342 = vadd.xlane.f32.xlu1 %v341_v0 }
  0xd8   : > { %353 = vadd.xlane.f32.xlu2 %v352_v1 }
 0x141   : > { %v340_v2 = vpop.xlane.xlu1 %339 }
 0x142   : > { %345 = vst.msk [vmem:[%s237_s21] sm:$0xff] %vm344_vm5, %v340_v2 }
 0x143   : > { %v351_v3 = vpop.xlane.xlu2 %350 }
 0x144   : > { %356 = vst.msk [vmem:[%s237_s21] sm:$0xff] %vm355_vm6, %v351_v3 }
 0x149   : > { %v343_v4 = vpop.xlane.xlu1 %342 }
 0x14a   : > { %346 = vst.msk [vmem:[%s237_s21 + $0x8] sm:$0xff] %vm344_vm5, %v343_v4 }
 0x14b   : > { %v354_v5 = vpop.xlane.xlu2 %353 }
 0x14c   : > { %357 = vst.msk [vmem:[%s237_s21 + $0x8] sm:$0xff] %vm355_vm6, %v354_v5 }
 0x14d PF: > { %s16_s18 = sadd.s32 1, %s489_s18  }
 0x14e   : > { %p13_p4 = scmp.ge.s32.totalorder %s16_s18, 4  }
 0x150   :  { %15 = sbr.rel (!%p13_p4) target bundleno = 1 (0x1), region = 78 }

</bundles_post_ra>
